<compile_context>
chip_gen: v6e
topology: v6e:2x2x1
jax: 0.10.0
libtpu: 0.0.40
codegen_flags: <defaults>
</compile_context>

<pallas_src>
import functools

import jax
import jax.numpy as jnp
from jax.experimental import pallas as pl
from jax.experimental.pallas import tpu as pltpu


def _sd_cov_kernel(x_ref, w_ref, out_ref):
    """One grid step: TB rows of the batched SDCovarianceMatrix forward.

    x_ref:   (TB, ni+1)  input rows with a trailing constant-1 column (bias folded)
    w_ref:   (ni+1, nh)  [W^T ; b] augmented weight (VMEM-resident across the grid)
    out_ref: (TB, nh*nh) row-major flattened (nh, nh) covariance per input row
    """
    nh = w_ref.shape[1]
    nh2 = out_ref.shape[1]
    f32 = jnp.float32

    # h = relu(x @ W^T + b) -- single MXU pass with M = TB.
    h = jnp.dot(x_ref[...], w_ref[...], preferred_element_type=f32)
    h = jnp.maximum(h, 0.0)                          # (TB, nh)
    hh = h * h                                       # (TB, nh)

    # Closed form of L @ L^T with L = tril(h h^T) + I:
    #   out[i,k] = h_i h_k (min(C_i, C_k) + 1 + [i==k]) + [i==k],  C = cumsum(h^2).
    # Build the 0/1 selector matrices (and the flat identity) in-kernel from iota.
    r = jax.lax.broadcasted_iota(jnp.int32, (nh, nh2), 0)       # contraction row j
    l = jax.lax.broadcasted_iota(jnp.int32, (nh, nh2), 1)       # flat index l = i*nh+k
    k_row = jax.lax.broadcasted_iota(jnp.int32, (1, nh), 1)     # 0..nh-1
    kof = jnp.tile(k_row, (1, nh))                              # l % nh (no int div)
    lane = jax.lax.broadcasted_iota(jnp.int32, (1, nh2), 1)

    e_i = ((l >= r * nh) & (l < (r + 1) * nh)).astype(f32)      # [r == l // nh]
    e_k = (r == kof).astype(f32)                                # [r == l %  nh]
    c_i = (l >= r * nh).astype(f32)                             # [r <= l // nh]
    c_k = (r <= kof).astype(f32)                                # [r <= l %  nh]
    eye = (lane == kof * (nh + 1)).astype(f32)                  # [i == k], (1, nh2)

    h_i = jnp.dot(h, e_i, preferred_element_type=f32)           # h[b, l//nh]
    h_k = jnp.dot(h, e_k, preferred_element_type=f32)           # h[b, l%nh]
    cs_i = jnp.dot(hh, c_i, preferred_element_type=f32)         # C[b, l//nh]
    cs_k = jnp.dot(hh, c_k, preferred_element_type=f32)         # C[b, l%nh]

    out_ref[...] = h_i * h_k * (jnp.minimum(cs_i, cs_k) + 1.0 + eye) + eye


def _round_up(v, m):
    return (v + m - 1) // m * m


@functools.partial(jax.jit, static_argnames=("block_b",))
def sd_covariance_matrix(x, w, b, *, block_b=128):
    """Batched SDCovarianceMatrix forward.

    x: (B, ni) or (ni,)   input vectors
    w: (ni, nh)           linear weight, pre-transposed (h = x @ w + b)
    b: (nh,)              linear bias
    returns (B, nh, nh) float32  (or (nh, nh) if x was 1-D)
    """
    squeeze = x.ndim == 1
    if squeeze:
        x = x[None, :]
    B, ni = x.shape
    nh = w.shape[1]

    # Fold the bias into the matmul: constant-1 column on x, bias row on w.
    x_aug = jnp.concatenate(
        [x.astype(jnp.float32), jnp.ones((B, 1), jnp.float32)], axis=1)
    w_aug = jnp.concatenate(
        [w.astype(jnp.float32), b.astype(jnp.float32)[None, :]], axis=0)

    tb = min(block_b, _round_up(B, 8))
    bp = _round_up(B, tb)
    if bp != B:
        x_aug = jnp.concatenate(
            [x_aug, jnp.zeros((bp - B, ni + 1), jnp.float32)], axis=0)

    out_flat = pl.pallas_call(
        _sd_cov_kernel,
        out_shape=jax.ShapeDtypeStruct((bp, nh * nh), jnp.float32),
        grid=(bp // tb,),
        in_specs=[
            pl.BlockSpec((tb, ni + 1), lambda i: (i, 0)),   # batch-tiled input
            pl.BlockSpec((ni + 1, nh), lambda i: (0, 0)),   # weights stay resident
        ],
        out_specs=pl.BlockSpec((tb, nh * nh), lambda i: (i, 0)),  # lane-dense output
        compiler_params=pltpu.CompilerParams(
            dimension_semantics=("parallel",)),
    )(x_aug, w_aug)

    out = out_flat[:B].reshape(B, nh, nh)
    return out[0] if squeeze else out


if __name__ == "__main__":
    ni, nh, batch = 32, 8, 256

    key = jax.random.PRNGKey(0)
    kx, kw = jax.random.split(key)

    # Parameters mirroring init_weights(): weight ~ N(0, 0.1), bias = 0.1.
    x = jax.random.normal(kx, (batch, ni), dtype=jnp.float32)
    w = 0.1 * jax.random.normal(kw, (ni, nh), dtype=jnp.float32)
    b = jnp.full((nh,), 0.1, dtype=jnp.float32)

    out = jax.block_until_ready(sd_covariance_matrix(x, w, b))

    # Pure-JAX reference (straight transcription of the PyTorch forward, per row).
    mask = jnp.tril(jnp.ones((nh, nh), jnp.float32))            # np.tri(nh)
    h = jnp.maximum(x @ w + b, 0.0)
    L = h[:, :, None] * h[:, None, :] * mask[None] \
        + jnp.eye(nh, dtype=jnp.float32)[None]
    ref = jnp.einsum("bij,bkj->bik", L, L)

    assert out.shape == (batch, nh, nh) and out.dtype == jnp.float32
    assert jnp.allclose(out, ref, atol=1e-3, rtol=1e-3), "kernel/reference mismatch"

    # Single-vector path matches the original module's forward exactly.
    out1 = jax.block_until_ready(sd_covariance_matrix(x[0], w, b))
    assert out1.shape == (nh, nh)
    assert jnp.allclose(out1, ref[0], atol=1e-3, rtol=1e-3), "single-vector mismatch"

    print("KERNEL_OK")
</pallas_src>

<mosaic_0001>
module attributes {stable_mosaic.version = 11 : i64} {
  func.func @_sd_cov_kernel(%arg0: i32, %arg1: memref<128x33xf32, #tpu.memory_space<vmem>>, %arg2: memref<33x8xf32, #tpu.memory_space<vmem>>, %arg3: memref<128x64xf32, #tpu.memory_space<vmem>>) attributes {dimension_semantics = [#tpu.dimension_semantics<parallel>], iteration_bounds = array<i64: 2>, scalar_prefetch = 0 : i64, scratch_operands = 0 : i64, tpu.core_type = #tpu.core_type<tc>, window_params = [{transform_indices = @transform_0, window_bounds = array<i64: 128, 33>}, {pipeline_mode = #tpu.pipeline_mode<synchronous>, transform_indices = @transform_1, window_bounds = array<i64: 33, 8>}, {transform_indices = @transform_2, window_bounds = array<i64: 128, 64>}]} {
    %c0 = arith.constant 0 : index
    %c0_0 = arith.constant 0 : index
    %0 = vector.load %arg1[%c0, %c0_0] : memref<128x33xf32, #tpu.memory_space<vmem>>, vector<128x33xf32>
    %c0_1 = arith.constant 0 : index
    %c0_2 = arith.constant 0 : index
    %1 = vector.load %arg2[%c0_1, %c0_2] : memref<33x8xf32, #tpu.memory_space<vmem>>, vector<33x8xf32>
    %cst = arith.constant dense<0.000000e+00> : vector<128x8xf32>
    %2 = tpu.matmul %0, %1, %cst {dimension_numbers = #tpu.dot_dimension_numbers<[1], [0], [0], [1], [0, 0, 1, 1], [], []>} : vector<128x33xf32>, vector<33x8xf32>, vector<128x8xf32> -> vector<128x8xf32>
    %cst_3 = arith.constant 0.000000e+00 : f32
    %3 = vector.broadcast %cst_3 : f32 to vector<128x8xf32>
    %4 = arith.maximumf %2, %3 : vector<128x8xf32>
    %5 = arith.mulf %4, %4 : vector<128x8xf32>
    %6 = tpu.iota {dimensions = array<i32: 0>} : vector<8x64xi32>
    %7 = tpu.iota {dimensions = array<i32: 1>} : vector<8x64xi32>
    %8 = tpu.iota {dimensions = array<i32: 1>} : vector<1x8xi32>
    %9 = tpu.concatenate %8, %8, %8, %8, %8, %8, %8, %8 in 1 : vector<1x8xi32>, vector<1x8xi32>, vector<1x8xi32>, vector<1x8xi32>, vector<1x8xi32>, vector<1x8xi32>, vector<1x8xi32>, vector<1x8xi32> -> vector<1x64xi32>
    %10 = tpu.iota {dimensions = array<i32: 1>} : vector<1x64xi32>
    %c8_i32 = arith.constant 8 : i32
    %11 = vector.broadcast %c8_i32 : i32 to vector<8x64xi32>
    %12 = arith.muli %6, %11 : vector<8x64xi32>
    %13 = arith.cmpi sge, %7, %12 : vector<8x64xi32>
    %c1_i32 = arith.constant 1 : i32
    %14 = vector.broadcast %c1_i32 : i32 to vector<8x64xi32>
    %15 = arith.addi %6, %14 : vector<8x64xi32>
    %c8_i32_4 = arith.constant 8 : i32
    %16 = vector.broadcast %c8_i32_4 : i32 to vector<8x64xi32>
    %17 = arith.muli %15, %16 : vector<8x64xi32>
    %18 = arith.cmpi slt, %7, %17 : vector<8x64xi32>
    %19 = arith.andi %13, %18 : vector<8x64xi1>
    %20 = arith.extui %19 : vector<8x64xi1> to vector<8x64xi32>
    %21 = arith.sitofp %20 : vector<8x64xi32> to vector<8x64xf32>
    %22 = vector.broadcast %9 : vector<1x64xi32> to vector<8x64xi32>
    %23 = arith.cmpi eq, %6, %22 : vector<8x64xi32>
    %24 = arith.extui %23 : vector<8x64xi1> to vector<8x64xi32>
    %25 = arith.sitofp %24 : vector<8x64xi32> to vector<8x64xf32>
    %c8_i32_5 = arith.constant 8 : i32
    %26 = vector.broadcast %c8_i32_5 : i32 to vector<8x64xi32>
    %27 = arith.muli %6, %26 : vector<8x64xi32>
    %28 = arith.cmpi sge, %7, %27 : vector<8x64xi32>
    %29 = arith.extui %28 : vector<8x64xi1> to vector<8x64xi32>
    %30 = arith.sitofp %29 : vector<8x64xi32> to vector<8x64xf32>
    %31 = vector.broadcast %9 : vector<1x64xi32> to vector<8x64xi32>
    %32 = arith.cmpi sle, %6, %31 : vector<8x64xi32>
    %33 = arith.extui %32 : vector<8x64xi1> to vector<8x64xi32>
    %34 = arith.sitofp %33 : vector<8x64xi32> to vector<8x64xf32>
    %c9_i32 = arith.constant 9 : i32
    %35 = vector.broadcast %c9_i32 : i32 to vector<1x64xi32>
    %36 = arith.muli %9, %35 : vector<1x64xi32>
    %37 = arith.cmpi eq, %10, %36 : vector<1x64xi32>
    %38 = arith.extui %37 : vector<1x64xi1> to vector<1x64xi32>
    %39 = arith.sitofp %38 : vector<1x64xi32> to vector<1x64xf32>
    %cst_6 = arith.constant dense<0.000000e+00> : vector<128x64xf32>
    %40 = tpu.matmul %4, %21, %cst_6 {dimension_numbers = #tpu.dot_dimension_numbers<[1], [0], [0], [1], [0, 0, 1, 1], [], []>} : vector<128x8xf32>, vector<8x64xf32>, vector<128x64xf32> -> vector<128x64xf32>
    %cst_7 = arith.constant dense<0.000000e+00> : vector<128x64xf32>
    %41 = tpu.matmul %4, %25, %cst_7 {dimension_numbers = #tpu.dot_dimension_numbers<[1], [0], [0], [1], [0, 0, 1, 1], [], []>} : vector<128x8xf32>, vector<8x64xf32>, vector<128x64xf32> -> vector<128x64xf32>
    %cst_8 = arith.constant dense<0.000000e+00> : vector<128x64xf32>
    %42 = tpu.matmul %5, %30, %cst_8 {dimension_numbers = #tpu.dot_dimension_numbers<[1], [0], [0], [1], [0, 0, 1, 1], [], []>} : vector<128x8xf32>, vector<8x64xf32>, vector<128x64xf32> -> vector<128x64xf32>
    %cst_9 = arith.constant dense<0.000000e+00> : vector<128x64xf32>
    %43 = tpu.matmul %5, %34, %cst_9 {dimension_numbers = #tpu.dot_dimension_numbers<[1], [0], [0], [1], [0, 0, 1, 1], [], []>} : vector<128x8xf32>, vector<8x64xf32>, vector<128x64xf32> -> vector<128x64xf32>
    %44 = arith.mulf %40, %41 : vector<128x64xf32>
    %45 = arith.minimumf %42, %43 : vector<128x64xf32>
    %cst_10 = arith.constant 1.000000e+00 : f32
    %46 = vector.broadcast %cst_10 : f32 to vector<128x64xf32>
    %47 = arith.addf %45, %46 : vector<128x64xf32>
    %48 = vector.broadcast %39 : vector<1x64xf32> to vector<128x64xf32>
    %49 = arith.addf %47, %48 : vector<128x64xf32>
    %50 = arith.mulf %44, %49 : vector<128x64xf32>
    %51 = vector.broadcast %39 : vector<1x64xf32> to vector<128x64xf32>
    %52 = arith.addf %50, %51 : vector<128x64xf32>
    %c0_11 = arith.constant 0 : index
    %c0_12 = arith.constant 0 : index
    %53 = vector.load %arg3[%c0_11, %c0_12] : memref<128x64xf32, #tpu.memory_space<vmem>>, vector<128x64xf32>
    tpu.vector_store %arg3[%c0_11, %c0_12], %52 {strides = array<i32>} : memref<128x64xf32, #tpu.memory_space<vmem>>, vector<128x64xf32>,
    return
  }
  func.func @transform_0(%arg0: i32) -> (i32, i32) {
    %c0_i32 = arith.constant 0 : i32
    %c0_i32_0 = arith.constant 0 : i32
    return %arg0, %c0_i32 : i32, i32
  }
  func.func @transform_1(%arg0: i32) -> (i32, i32) {
    %c0_i32 = arith.constant 0 : i32
    %c0_i32_0 = arith.constant 0 : i32
    %c0_i32_1 = arith.constant 0 : i32
    return %c0_i32, %c0_i32_0 : i32, i32
  }
  func.func @transform_2(%arg0: i32) -> (i32, i32) {
    %c0_i32 = arith.constant 0 : i32
    %c0_i32_0 = arith.constant 0 : i32
    return %arg0, %c0_i32 : i32, i32
  }
}

</mosaic_0001>

<bundles_post_ra>
// kernel: sd_covariance_matrix.1
= control target key start
LH: loop header
LB: loop body
LE: loop exit
PB: predicated region body
PF: predicated region fallthrough
CT: control target
= control target key end

     0   :  { %s1682_s9 = smov 0   ;;  %s2086_s0 = inlined_call_operand.vmem [shape: f32[256,33], index: 0, kind: input, shape index: {}]   ;;  %s2087_s1 = inlined_call_operand.vmem [shape: f32[33,8], index: 1, kind: input, shape index: {}]   ;;  %s2088_s2 = inlined_call_operand.vmem [shape: f32[256,64], index: 2, kind: output, shape index: {}]  }
   0x1 LB: > { %s1303_s10 = sadd.s32 4294967295, %s1656_s9   ;;  %p1307_p0 = scmp.ge.s32.totalorder %s1656_s9, 1  ;;  %s1656_s9 = sphi %s1682_s9, %s12_s9  }
   0x2   : > { %p113_p1 = scmp.lt.s32.totalorder %s1656_s9, 3 }
   0x4   : > { %p114_p2 = pnand %p1307_p0, %p113_p1 }
   0x5   : > { %s1308_s15 = sshll.u32 (!%p114_p2), %s1303_s10, 4  ;;  %s1658_s20 = smov (!%p114_p2), 8  }
   0x6   : > { %117 = sbr.rel (%p114_p2) target bundleno = 518 (0x206), region = 28  ;;  %p136_p3 = scmp.lt.s32.totalorder (!%p114_p2), %s1308_s15, 31 }
   0x7   : > { %s1659_s22 = smov (!%p114_p2), 24   ;;  %s1660_s28 = smov (!%p114_p2), 16  }
   0x8   : > { %s1661_s29 = smov (!%p114_p2), 32   ;;  %s1662_s30 = smov (!%p114_p2), 40  }
   0x9   : > { %s1663_s3 = smov (!%p114_p2), 48   ;;  %s1664_s4 = smov (!%p114_p2), 56  }
   0xb   : > { %v167_v0 = vld [vmem:[%s2087_s1 + $0x20] sm:$0x1]  ;;  %vm217_vm0 = vcmask 1040384   ;;  %v166_v1 = vld [vmem:[%s2087_s1 + $0x18] sm:$0xff]  ;;  %v398_v2 = vlaneseq  ;;  %v165_v3 = vld [vmem:[%s2087_s1 + $0x10] sm:$0xff]  ;;  %s2092_s15 = smov (!%p136_p3, %s1308_s15), 31 }
   0xc   : > { %1493 = vmatprep.subr.msk.mxu0 %vm217_vm0, %v167_v0  ;;  %v164_v5 = vld [vmem:[%s2087_s1 + $0x8] sm:$0xff]  ;;  %s1309_s21 = sshll.u32 %s2092_s15, 3  ;;  %vm168_vm1 = vcmask 269312   ;;  %v163_v6 = vld [vmem:[%s2087_s1] sm:$0xff]  ;;  %v1665_v28 = vmov 1.0   ;;  %vm416_vm5 = vcmask 64512  }
   0xd   : > { %1494 = vmatpush3.msk.msra.mxu0 %vm217_vm0, %v167_v0  ;;  %v1700_v4 = vand.u32 127, %v398_v2  ;;  %s1718_s27 = scalar_lea.vmem %s2086_s0, %s1309_s21  ;;  %v1758_v23 = vshrl.u32 %v398_v2, 7  ;;  %vm418_vm6 = vcmask 130048   ;;  %vm420_vm7 = vcmask 195584   ;;  %s1995_s7 = scalar_lea.vmem %s2088_s2, %s1309_s21 }
   0xe   : > { %1495 = vmatprep.subr.mxu0 %v166_v1  ;;  %v147_v7 = vld [vmem:[%s1718_s27] sm:$0xff]  ;;  %v148_v8 = vld [vmem:[%s1718_s27 + $0x8] sm:$0xff]  ;;  %v149_v9 = vld [vmem:[%s1718_s27 + $0x10] sm:$0xff]  ;;  %vm422_vm8 = vcmask 261120   ;;  %vm424_vm9 = vcmask 326656   ;;  %vm426_vm10 = vcmask 392192  }
   0xf   : > { %1496 = vmatpush3.msra.mxu0 %v166_v1  ;;  %402 = vrot.lane.b32.xlu0 %v1700_v4, %s1658_s20  ;;  %v150_v10 = vld [vmem:[%s1718_s27 + $0x18] sm:$0xff]  ;;  %v151_v11 = vld [vmem:[%s1718_s27 + $0x20] sm:$0xff]  ;;  %v152_v12 = vld [vmem:[%s1718_s27 + $0x28] sm:$0xff]  ;;  %v432_v24 = vadd.s32 1, %v1758_v23  ;;  %v430_v25 = vmul.u32 8, %v1758_v23  ;;  %vm428_vm11 = vcmask 457728  }
  0x10   : > { %1497 = vmatprep.subr.mxu0 %v165_v3  ;;  %406 = vrot.lane.b32.xlu1 %v1700_v4, %s1659_s22  ;;  %v153_v13 = vld [vmem:[%s1718_s27 + $0x30] sm:$0xff]  ;;  %v154_v14 = vld [vmem:[%s1718_s27 + $0x38] sm:$0xff]  ;;  %v155_v15 = vld [vmem:[%s1718_s27 + $0x40] sm:$0xff]  ;;  %v440_v41 = vsub.s32 0, %v1758_v23  ;;  %v1666_v46 = vmov 0.0   ;;  %vm1230_vm15 = vcmask 523264  }
  0x11   : > { %1498 = vmatpush3.msra.mxu0 %v165_v3  ;;  %1503 = vmatprep.mubr.msk.f32.mxu0 %vm168_vm1, %v147_v7  ;;  %v156_v16 = vld [vmem:[%s1718_s27 + $0x48] sm:$0xff]  ;;  %v157_v17 = vld [vmem:[%s1718_s27 + $0x50] sm:$0xff]  ;;  %v158_v18 = vld [vmem:[%s1718_s27 + $0x58] sm:$0xff]  ;;  %v433_v26 = vmul.u32 8, %v432_v24  ;;  %vm1763_vm2 = vcmp.ge.s32.totalorder %v1700_v4, %v430_v25 }
  0x12   : > { %1499 = vmatprep.subr.mxu0 %v164_v5  ;;  %v159_v19 = vld [vmem:[%s1718_s27 + $0x60] sm:$0xff]  ;;  %v160_v20 = vld [vmem:[%s1718_s27 + $0x68] sm:$0xff]  ;;  %v161_v21 = vld [vmem:[%s1718_s27 + $0x70] sm:$0xff] }
  0x13   : > { %1500 = vmatpush3.msra.mxu0 %v164_v5  ;;  %404 = vrot.lane.b32.xlu0 %v1700_v4, %s1660_s28  ;;  %v162_v22 = vld [vmem:[%s1718_s27 + $0x78] sm:$0xff]  ;;  %vm434_vm3 = vcmp.lt.s32.totalorder %v1700_v4, %v433_v26 }
  0x14   : > { %1501 = vmatprep.subr.mxu0 %v163_v6  ;;  %408 = vrot.lane.b32.xlu1 %v1700_v4, %s1661_s29  ;;  %vm435_vm4 = vmand %vm1763_vm2, %vm434_vm3 }
  0x15   : > { %1502 = vmatpush3.msra.mxu0 %v163_v6  ;;  %1631 = vmatprep.subr.msk.mxu1 %vm435_vm4, %v1665_v28 }
  0x16   : > { %1504 = vmatmul.mubr.msk.f32.vlgmr.msra.gmra.mxu0 %vm168_vm1, %v148_v8  ;;  %1527 = vmatprep.subr.msk.mxu0 %vm435_vm4, %v1665_v28 }
  0x17   : > { %1506 = vmatprep.mubr.msk.f32.mxu0 %vm168_vm1, %v149_v9  ;;  %410 = vrot.lane.b32.xlu0 %v1700_v4, %s1662_s30 }
  0x18   : > { %412 = vrot.lane.b32.xlu1 %v1700_v4, %s1663_s3  ;;  %1528 = vmatpush3.msk.msra.mxu0 %vm435_vm4, %v1665_v28 }
  0x19   : > { %1632 = vmatpush3.msk.msra.mxu1 %vm435_vm4, %v1665_v28  ;;  %1579 = vmatprep.subr.msk.mxu0 %vm1763_vm2, %v1665_v28 }
  0x1a   : > { %1507 = vmatmul.mubr.msk.f32.gmra.mxu0 %vm168_vm1, %v150_v10 }
  0x1b   : > { %1509 = vmatprep.mubr.msk.f32.mxu0 %vm168_vm1, %v151_v11  ;;  %414 = vrot.lane.b32.xlu0 %v1700_v4, %s1664_s4 }
  0x1e   : > { %1510 = vmatmul.mubr.msk.f32.gmra.mxu0 %vm168_vm1, %v152_v12 }
  0x1f   : > { %1512 = vmatprep.mubr.msk.f32.mxu0 %vm168_vm1, %v153_v13 }
  0x22   : > { %1513 = vmatmul.mubr.msk.f32.gmra.mxu0 %vm168_vm1, %v154_v14 }
  0x23   : > { %1515 = vmatprep.mubr.msk.f32.mxu0 %vm168_vm1, %v155_v15 }
  0x26   : > { %1516 = vmatmul.mubr.msk.f32.gmra.mxu0 %vm168_vm1, %v156_v16 }
  0x27   : > { %1518 = vmatprep.mubr.msk.f32.mxu0 %vm168_vm1, %v157_v17 }
  0x2a   : > { %1519 = vmatmul.mubr.msk.f32.gmra.mxu0 %vm168_vm1, %v158_v18 }
  0x2b   : > { %1521 = vmatprep.mubr.msk.f32.mxu0 %vm168_vm1, %v159_v19 }
  0x2e   : > { %1522 = vmatmul.mubr.msk.f32.gmra.mxu0 %vm168_vm1, %v160_v20 }
  0x2f   : > { %1524 = vmatprep.mubr.msk.f32.mxu0 %vm168_vm1, %v161_v21 }
  0x32   : > { %1525 = vmatmul.mubr.msk.f32.gmra.mxu0 %vm168_vm1, %v162_v22 }
  0x81   : > { %v403_v29 = vpop.permute.xlu0 %402 }
  0x82   : > { %v407_v30 = vpop.permute.xlu1 %406  ;;  %v417_v31 = vsel %vm416_vm5, %v1700_v4, %v403_v29 }
  0x85   : > { %v405_v32 = vpop.permute.xlu0 %404 }
  0x86   : > { %v419_v33 = vsel %vm418_vm6, %v417_v31, %v405_v32  ;;  %v409_v34 = vpop.permute.xlu1 %408 }
  0x87   : > { %v421_v35 = vsel %vm420_vm7, %v419_v33, %v407_v30 }
  0x88   : > { %v423_v36 = vsel %vm422_vm8, %v421_v35, %v409_v34 }
  0x89   : > { %v411_v37 = vpop.permute.xlu0 %410 }
  0x8a   : > { %v425_v38 = vsel %vm424_vm9, %v423_v36, %v411_v37  ;;  %v413_v39 = vpop.permute.xlu1 %412 }
  0x8b   : > { %v427_v40 = vsel %vm426_vm10, %v425_v38, %v413_v39 }
  0x8d   : > { %v415_v42 = vpop.permute.xlu0 %414 }
  0x8e   : > { %v429_v43 = vsel %vm428_vm11, %v427_v40, %v415_v42 }
  0x8f   : > { %v1780_v44 = vrot.slane %v429_v43, %v440_v41  ;;  %v450_v45 = vmul.u32 9, %v429_v43 }
  0x91   : > { %vm451_vm12 = vcmp.eq.s32.totalorder %v1700_v4, %v450_v45  ;;  %vm442_vm13 = vcmp.eq.s32.totalorder %v1758_v23, %v1780_v44  ;;  %vm447_vm14 = vcmp.le.s32.totalorder %v1758_v23, %v1780_v44 }
  0x92   : > { %v1333_v47 = vsel %vm451_vm12, 1.0, %v1666_v46  ;;  %1553 = vmatprep.subr.msk.mxu1 %vm442_vm13, %v1665_v28 }
  0x93   : > { %v1791_v48 = vrot.slane %v1333_v47, %v440_v41 }
  0xd6   : > { %v1505_v49 = vpop.f32.mrf.mxu0 }
  0xd7   : > { %v1795_v52 = vmax.f32 %v1505_v49, 0.0 }
  0xd8   : > { %v287_v50 = vpop.f32.mrf.mxu0 }
  0xd9   : > { %v1793_v51 = vmax.f32 %v287_v50, 0.0  ;;  %v1830_v1 = vmul.f32 %v1795_v52, %v1795_v52 }
  0xda   : > { %v1508_v53 = vpop.f32.mrf.mxu0 }
  0xdb   : > { %1529 = vmatprep.mubr.msk.f32.mxu0 %vm416_vm5, %v1793_v51  ;;  %v1806_v56 = vmax.f32 %v1508_v53, 0.0  ;;  %v1818_v62 = vmul.f32 %v1793_v51, %v1793_v51 }
  0xdc   : > { %v297_v54 = vpop.f32.mrf.mxu0  ;;  %1530 = vmatmul.mubr.msk.f32.vlgmr.msra.gmra.mxu0 %vm416_vm5, %v1795_v52 }
  0xdd   : > { %v1801_v55 = vmax.f32 %v297_v54, 0.0  ;;  %1580 = vmatpush3.msk.msra.mxu0 %vm1763_vm2, %v1665_v28  ;;  %v1852_v7 = vmul.f32 %v1806_v56, %v1806_v56 }
  0xde   : > { %v1511_v57 = vpop.f32.mrf.mxu0 }
  0xdf   : > { %1532 = vmatprep.mubr.msk.f32.mxu0 %vm416_vm5, %v1801_v55  ;;  %v1814_v60 = vmax.f32 %v1511_v57, 0.0  ;;  %v1836_v4 = vmul.f32 %v1801_v55, %v1801_v55 }
  0xe0   : > { %v307_v58 = vpop.f32.mrf.mxu0  ;;  %1533 = vmatmul.mubr.msk.f32.gmra.mxu0 %vm416_vm5, %v1806_v56 }
  0xe1   : > { %v1812_v59 = vmax.f32 %v307_v58, 0.0  ;;  %v387_v13 = vmul.f32 %v1814_v60, %v1814_v60 }
  0xe2   : > { %v1514_v61 = vpop.f32.mrf.mxu0 }
  0xe3   : > { %1535 = vmatprep.mubr.msk.f32.mxu0 %vm416_vm5, %v1812_v59  ;;  %v1832_v2 = vmax.f32 %v1514_v61, 0.0  ;;  %v1860_v10 = vmul.f32 %v1812_v59, %v1812_v59 }
  0xe4   : > { %v317_v63 = vpop.f32.mrf.mxu0  ;;  %1536 = vmatmul.mubr.msk.f32.gmra.mxu0 %vm416_vm5, %v1814_v60 }
  0xe5   : > { %v1824_v0 = vmax.f32 %v317_v63, 0.0  ;;  %1581 = vmatprep.mubr.msk.f32.mxu0 %vm416_vm5, %v1818_v62  ;;  %v389_v19 = vmul.f32 %v1832_v2, %v1832_v2 }
  0xe6   : > { %v1517_v3 = vpop.f32.mrf.mxu0 }
  0xe7   : > { %1538 = vmatprep.mubr.msk.f32.mxu1 %vm416_vm5, %v1824_v0  ;;  %v375_v8 = vmax.f32 %v1517_v3, 0.0  ;;  %v388_v16 = vmul.f32 %v1824_v0, %v1824_v0 }
  0xe8   : > { %v327_v5 = vpop.f32.mrf.mxu0  ;;  %1539 = vmatmul.mubr.msk.f32.vlgmr.msra.gmra.mxu1 %vm416_vm5, %v1832_v2  ;;  %1582 = vmatmul.mubr.msk.f32.vlgmr.msra.gmra.mxu0 %vm416_vm5, %v1830_v1 }
  0xe9   : > { %v374_v6 = vmax.f32 %v327_v5, 0.0  ;;  %1554 = vmatpush3.msk.msra.mxu1 %vm442_vm13, %v1665_v28  ;;  %1584 = vmatprep.mubr.msk.f32.mxu0 %vm416_vm5, %v1836_v4  ;;  %v391_v26 = vmul.f32 %v375_v8, %v375_v8 }
  0xea   : > { %1605 = vmatprep.subr.msk.mxu1 %vm447_vm14, %v1665_v28  ;;  %v1520_v9 = vpop.f32.mrf.mxu0 }
  0xeb   : > { %1541 = vmatprep.mubr.msk.f32.mxu1 %vm416_vm5, %v374_v6  ;;  %v377_v14 = vmax.f32 %v1520_v9, 0.0  ;;  %v390_v22 = vmul.f32 %v374_v6, %v374_v6 }
  0xec   : > { %v337_v11 = vpop.f32.mrf.mxu0  ;;  %1542 = vmatmul.mubr.msk.f32.gmra.mxu1 %vm416_vm5, %v375_v8  ;;  %1585 = vmatmul.mubr.msk.f32.gmra.mxu0 %vm416_vm5, %v1852_v7 }
  0xed   : > { %v376_v12 = vmax.f32 %v337_v11, 0.0  ;;  %1587 = vmatprep.mubr.msk.f32.mxu0 %vm416_vm5, %v1860_v10  ;;  %v393_v30 = vmul.f32 %v377_v14, %v377_v14 }
  0xee   : > { %v1523_v15 = vpop.f32.mrf.mxu0 }
  0xef   : > { %1544 = vmatprep.mubr.msk.f32.mxu1 %vm416_vm5, %v376_v12  ;;  %v379_v20 = vmax.f32 %v1523_v15, 0.0  ;;  %v392_v29 = vmul.f32 %v376_v12, %v376_v12 }
  0xf0   : > { %v347_v17 = vpop.f32.mrf.mxu0  ;;  %1545 = vmatmul.mubr.msk.f32.gmra.mxu1 %vm416_vm5, %v377_v14  ;;  %1588 = vmatmul.mubr.msk.f32.gmra.mxu0 %vm416_vm5, %v387_v13 }
  0xf1   : > { %v378_v18 = vmax.f32 %v347_v17, 0.0  ;;  %1590 = vmatprep.mubr.msk.f32.mxu0 %vm416_vm5, %v388_v16  ;;  %v395_v32 = vmul.f32 %v379_v20, %v379_v20 }
  0xf2   : > { %v1526_v21 = vpop.f32.mrf.mxu0 }
  0xf3   : > { %1547 = vmatprep.mubr.msk.f32.mxu1 %vm416_vm5, %v378_v18  ;;  %v381_v27 = vmax.f32 %v1526_v21, 0.0  ;;  %v394_v31 = vmul.f32 %v378_v18, %v378_v18 }
  0xf4   : > { %v357_v24 = vpop.f32.mrf.mxu0  ;;  %1548 = vmatmul.mubr.msk.f32.gmra.mxu1 %vm416_vm5, %v379_v20  ;;  %1591 = vmatmul.mubr.msk.f32.gmra.mxu0 %vm416_vm5, %v389_v19 }
  0xf5   : > { %v380_v25 = vmax.f32 %v357_v24, 0.0  ;;  %1593 = vmatprep.mubr.msk.f32.mxu0 %vm416_vm5, %v390_v22  ;;  %v397_v34 = vmul.f32 %v381_v27, %v381_v27 }
  0xf7   : > { %1550 = vmatprep.mubr.msk.f32.mxu1 %vm416_vm5, %v380_v25  ;;  %v396_v33 = vmul.f32 %v380_v25, %v380_v25 }
  0xf8   : > { %1551 = vmatmul.mubr.msk.f32.gmra.mxu1 %vm416_vm5, %v381_v27  ;;  %1594 = vmatmul.mubr.msk.f32.gmra.mxu0 %vm416_vm5, %v391_v26 }
  0xf9   : > { %1555 = vmatprep.mubr.msk.f32.mxu1 %vm416_vm5, %v1793_v51  ;;  %1596 = vmatprep.mubr.msk.f32.mxu0 %vm416_vm5, %v392_v29 }
  0xfc   : > { %1556 = vmatmul.mubr.msk.f32.vlgmr.msra.gmra.mxu1 %vm416_vm5, %v1795_v52  ;;  %1597 = vmatmul.mubr.msk.f32.gmra.mxu0 %vm416_vm5, %v393_v30 }
  0xfd   : > { %1606 = vmatpush3.msk.msra.mxu1 %vm447_vm14, %v1665_v28  ;;  %1558 = vmatprep.mubr.msk.f32.mxu1 %vm416_vm5, %v1801_v55 }
  0xfe   : > { %1599 = vmatprep.mubr.msk.f32.mxu0 %vm416_vm5, %v394_v31 }
 0x100   : > { %1559 = vmatmul.mubr.msk.f32.gmra.mxu1 %vm416_vm5, %v1806_v56  ;;  %1600 = vmatmul.mubr.msk.f32.gmra.mxu0 %vm416_vm5, %v395_v32 }
 0x101   : > { %1561 = vmatprep.mubr.msk.f32.mxu1 %vm416_vm5, %v1812_v59  ;;  %1602 = vmatprep.mubr.msk.f32.mxu0 %vm416_vm5, %v396_v33 }
 0x104   : > { %1562 = vmatmul.mubr.msk.f32.gmra.mxu1 %vm416_vm5, %v1814_v60  ;;  %1603 = vmatmul.mubr.msk.f32.gmra.mxu0 %vm416_vm5, %v397_v34 }
 0x105   : > { %1564 = vmatprep.mubr.msk.f32.mxu1 %vm416_vm5, %v1824_v0 }
 0x108   : > { %1565 = vmatmul.mubr.msk.f32.gmra.mxu1 %vm416_vm5, %v1832_v2 }
 0x109   : > { %1567 = vmatprep.mubr.msk.f32.mxu1 %vm416_vm5, %v374_v6 }
 0x10c   : > { %1568 = vmatmul.mubr.msk.f32.gmra.mxu1 %vm416_vm5, %v375_v8 }
 0x10d   : > { %1570 = vmatprep.mubr.msk.f32.mxu1 %vm416_vm5, %v376_v12 }
 0x110   : > { %1571 = vmatmul.mubr.msk.f32.gmra.mxu1 %vm416_vm5, %v377_v14 }
 0x111   : > { %1573 = vmatprep.mubr.msk.f32.mxu1 %vm416_vm5, %v378_v18 }
 0x114   : > { %1574 = vmatmul.mubr.msk.f32.gmra.mxu1 %vm416_vm5, %v379_v20 }
 0x115   : > { %1576 = vmatprep.mubr.msk.f32.mxu1 %vm416_vm5, %v380_v25 }
 0x118   : > { %1577 = vmatmul.mubr.msk.f32.gmra.mxu1 %vm416_vm5, %v381_v27 }
 0x119   : > { %1607 = vmatprep.mubr.msk.f32.mxu1 %vm416_vm5, %v1818_v62 }
 0x11c   : > { %1608 = vmatmul.mubr.msk.f32.vlgmr.msra.gmra.mxu1 %vm416_vm5, %v1830_v1 }
 0x11d   : > { %1610 = vmatprep.mubr.msk.f32.mxu1 %vm416_vm5, %v1836_v4 }
 0x120   : > { %1611 = vmatmul.mubr.msk.f32.gmra.mxu1 %vm416_vm5, %v1852_v7 }
 0x121   : > { %1613 = vmatprep.mubr.msk.f32.mxu1 %vm416_vm5, %v1860_v10 }
 0x124   : > { %1614 = vmatmul.mubr.msk.f32.gmra.mxu1 %vm416_vm5, %v387_v13 }
 0x125   : > { %1616 = vmatprep.mubr.msk.f32.mxu1 %vm416_vm5, %v388_v16 }
 0x128   : > { %1617 = vmatmul.mubr.msk.f32.gmra.mxu1 %vm416_vm5, %v389_v19 }
 0x129   : > { %1619 = vmatprep.mubr.msk.f32.mxu1 %vm416_vm5, %v390_v22 }
 0x12c   : > { %1620 = vmatmul.mubr.msk.f32.gmra.mxu1 %vm416_vm5, %v391_v26 }
 0x12d   : > { %1622 = vmatprep.mubr.msk.f32.mxu1 %vm416_vm5, %v392_v29 }
 0x130   : > { %1623 = vmatmul.mubr.msk.f32.gmra.mxu1 %vm416_vm5, %v393_v30 }
 0x131   : > { %1625 = vmatprep.mubr.msk.f32.mxu1 %vm416_vm5, %v394_v31 }
 0x134   : > { %1626 = vmatmul.mubr.msk.f32.gmra.mxu1 %vm416_vm5, %v395_v32 }
 0x135   : > { %1628 = vmatprep.mubr.msk.f32.mxu1 %vm416_vm5, %v396_v33 }
 0x138   : > { %1629 = vmatmul.mubr.msk.f32.gmra.mxu1 %vm416_vm5, %v397_v34 }
 0x19c   : > { %v1531_v23 = vpop.f32.mrf.mxu0 }
 0x19e   : > { %v568_v35 = vpop.f32.mrf.mxu0 }
 0x1a0   : > { %v1534_v38 = vpop.f32.mrf.mxu0 }
 0x1a2   : > { %v578_v41 = vpop.f32.mrf.mxu0 }
 0x1a4   : > { %v1954_v44 = vpop.f32.mrf.mxu0 }
 0x1a6   : > { %v1960_v47 = vpop.f32.mrf.mxu0 }
 0x1a8   : > { %v1940_v28 = vpop.f32.mrf.mxu1  ;;  %v1583_v51 = vpop.f32.mrf.mxu0 }
 0x1aa   : > { %v1942_v36 = vpop.f32.mrf.mxu1  ;;  %v906_v54 = vpop.f32.mrf.mxu0 }
 0x1ac   : > { %v1944_v37 = vpop.f32.mrf.mxu1  ;;  %v1586_v57 = vpop.f32.mrf.mxu0 }
 0x1ae   : > { %v1946_v39 = vpop.f32.mrf.mxu1  ;;  %v916_v60 = vpop.f32.mrf.mxu0 }
 0x1b0   : > { %v1948_v40 = vpop.f32.mrf.mxu1  ;;  %v1589_v63 = vpop.f32.mrf.mxu0 }
 0x1b2   : > { %v1950_v42 = vpop.f32.mrf.mxu1  ;;  %v926_v2 = vpop.f32.mrf.mxu0 }
 0x1b4   : > { %v1952_v43 = vpop.f32.mrf.mxu1  ;;  %v1592_v5 = vpop.f32.mrf.mxu0 }
 0x1b6   : > { %v1956_v45 = vpop.f32.mrf.mxu1  ;;  %v936_v8 = vpop.f32.mrf.mxu0 }
 0x1b8   : > { %v1958_v46 = vpop.f32.mrf.mxu1  ;;  %v1984_v12 = vpop.f32.mrf.mxu0 }
 0x1ba   : > { %v1962_v49 = vpop.f32.mrf.mxu1  ;;  %v1987_v21 = vpop.f32.mrf.mxu0 }
 0x1bc   : > { %v1557_v50 = vpop.f32.mrf.mxu1 }
 0x1bd   : > { %v1131_v17 = vmul.f32 %v1557_v50, %v1531_v23 }
 0x1be   : > { %v713_v52 = vpop.f32.mrf.mxu1 }
 0x1bf   : > { %v1130_v22 = vmul.f32 %v713_v52, %v568_v35  ;;  %v1598_v35 = vpop.f32.mrf.mxu0 }
 0x1c0   : > { %v1560_v53 = vpop.f32.mrf.mxu1 }
 0x1c1   : > { %v1133_v30 = vmul.f32 %v1560_v53, %v1534_v38 }
 0x1c2   : > { %v723_v55 = vpop.f32.mrf.mxu1 }
 0x1c3   : > { %v1132_v50 = vmul.f32 %v723_v55, %v578_v41 }
 0x1c4   : > { %v1563_v56 = vpop.f32.mrf.mxu1 }
 0x1c6   : > { %v733_v58 = vpop.f32.mrf.mxu1 }
 0x1c8   : > { %v1964_v59 = vpop.f32.mrf.mxu1 }
 0x1ca   : > { %v1966_v61 = vpop.f32.mrf.mxu1 }
 0x1cc   : > { %v1968_v62 = vpop.f32.mrf.mxu1 }
 0x1ce   : > { %v1970_v0 = vpop.f32.mrf.mxu1 }
 0x1d0   : > { %v1972_v1 = vpop.f32.mrf.mxu1 }
 0x1d2   : > { %v1974_v3 = vpop.f32.mrf.mxu1 }
 0x1d4   : > { %v1976_v4 = vpop.f32.mrf.mxu1 }
 0x1d6   : > { %v1978_v6 = vpop.f32.mrf.mxu1 }
 0x1d8   : > { %v1980_v7 = vpop.f32.mrf.mxu1 }
 0x1da   : > { %v1982_v9 = vpop.f32.mrf.mxu1 }
 0x1dc   : > { %v1609_v10 = vpop.f32.mrf.mxu1 }
 0x1dd   : > { %v1147_v11 = vmin.f32 %v1583_v51, %v1609_v10 }
 0x1de   : > { %v1051_v13 = vpop.f32.mrf.mxu1 }
 0x1df   : > { %v1163_v14 = vadd.f32 1.0, %v1147_v11  ;;  %v1146_v15 = vmin.f32 %v906_v54, %v1051_v13 }
 0x1e0   : > { %v1612_v16 = vpop.f32.mrf.mxu1 }
 0x1e1   : > { %v1183_v18 = vadd.f32 %v1791_v48, %v1163_v14  ;;  %v1162_v19 = vadd.f32 1.0, %v1146_v15  ;;  %v1149_v20 = vmin.f32 %v1586_v57, %v1612_v16  ;;  %v1135_v14 = vmul.f32 %v1563_v56, %v1954_v44 }
 0x1e2   : > { %v1061_v24 = vpop.f32.mrf.mxu1  ;;  %v1134_v15 = vmul.f32 %v733_v58, %v1960_v47 }
 0x1e3   : > { %v1199_v25 = vmul.f32 %v1183_v18, %v1131_v17  ;;  %v1182_v26 = vadd.f32 %v1791_v48, %v1162_v19  ;;  %v1165_v27 = vadd.f32 1.0, %v1149_v20  ;;  %v1148_v29 = vmin.f32 %v916_v60, %v1061_v24 }
 0x1e4   : > { %v1615_v31 = vpop.f32.mrf.mxu1 }
 0x1e5   : > { %v1215_v32 = vadd.f32 %v1199_v25, %v1791_v48  ;;  %v1198_v33 = vmul.f32 %v1182_v26, %v1130_v22  ;;  %v1185_v34 = vadd.f32 %v1791_v48, %v1165_v27  ;;  %v1164_v23 = vadd.f32 1.0, %v1148_v29 }
 0x1e6   : > { %v1151_v51 = vmin.f32 %v1589_v63, %v1615_v31  ;;  %v1071_v52 = vpop.f32.mrf.mxu1  ;;  %v956_v63 = vpop.f32.mrf.mxu0  ;;  %v1137_v22 = vmul.f32 %v1964_v59, %v1940_v28  ;;  %v1136_v26 = vmul.f32 %v1966_v61, %v1942_v36  ;;  %v1139_v31 = vmul.f32 %v1968_v62, %v1944_v37 }
 0x1e7   : > { %1232 = vst.msk [vmem:[%s1995_s7 + $0x8] sm:$0xff] %vm1230_vm15, %v1215_v32  ;;  %v1214_v54 = vadd.f32 %v1198_v33, %v1791_v48  ;;  %v1201_v57 = vmul.f32 %v1185_v34, %v1133_v30  ;;  %v1184_v38 = vadd.f32 %v1791_v48, %v1164_v23  ;;  %v1150_v53 = vmin.f32 %v926_v2, %v1071_v52 }
 0x1e8   : > { %v1167_v60 = vadd.f32 1.0, %v1151_v51  ;;  %v1618_v10 = vpop.f32.mrf.mxu1  ;;  %v1601_v25 = vpop.f32.mrf.mxu0 }
 0x1e9   : > { %1231 = vst.msk [vmem:[%s1995_s7] sm:$0xff] %vm1230_vm15, %v1214_v54  ;;  %v1217_v11 = vadd.f32 %v1201_v57, %v1791_v48  ;;  %v1200_v13 = vmul.f32 %v1184_v38, %v1132_v50  ;;  %v1166_v41 = vadd.f32 1.0, %v1150_v53  ;;  %v1153_v55 = vmin.f32 %v1592_v5, %v1618_v10 }
 0x1ea   : > { %v1187_v16 = vadd.f32 %v1791_v48, %v1167_v60  ;;  %v1081_v17 = vpop.f32.mrf.mxu1  ;;  %v966_v23 = vpop.f32.mrf.mxu0  ;;  %v1138_v54 = vmul.f32 %v1970_v0, %v1946_v39  ;;  %v1141_v57 = vmul.f32 %v1972_v1, %v1948_v40 }
 0x1eb   : > { %1234 = vst.msk [vmem:[%s1995_s7 + $0x18] sm:$0xff] %vm1230_vm15, %v1217_v11  ;;  %v1216_v2 = vadd.f32 %v1200_v13, %v1791_v48  ;;  %v1186_v18 = vadd.f32 %v1791_v48, %v1166_v41  ;;  %v1169_v19 = vadd.f32 1.0, %v1153_v55  ;;  %v1152_v20 = vmin.f32 %v936_v8, %v1081_v17 }
 0x1ec   : > { %v1203_v5 = vmul.f32 %v1187_v16, %v1135_v14  ;;  %v1621_v24 = vpop.f32.mrf.mxu1  ;;  %v1604_v13 = vpop.f32.mrf.mxu0  ;;  %v1140_v41 = vmul.f32 %v1974_v3, %v1950_v42  ;;  %v1143_v14 = vmul.f32 %v1976_v4, %v1952_v43 }
 0x1ed   : > { %1233 = vst.msk [vmem:[%s1995_s7 + $0x10] sm:$0xff] %vm1230_vm15, %v1216_v2  ;;  %v1202_v44 = vmul.f32 %v1186_v18, %v1134_v15  ;;  %v1189_v47 = vadd.f32 %v1791_v48, %v1169_v19  ;;  %v1168_v56 = vadd.f32 1.0, %v1152_v20  ;;  %v1155_v58 = vmin.f32 %v1984_v12, %v1621_v24 }
 0x1ee   : > { %v1219_v8 = vadd.f32 %v1203_v5, %v1791_v48  ;;  %v1091_v27 = vpop.f32.mrf.mxu1  ;;  %v976_v18 = vpop.f32.mrf.mxu0  ;;  %v1142_v19 = vmul.f32 %v1978_v6, %v1956_v45 }
 0x1ef   : > { %v1218_v28 = vadd.f32 %v1202_v44, %v1791_v48  ;;  %v1205_v59 = vmul.f32 %v1189_v47, %v1137_v22  ;;  %v1188_v29 = vadd.f32 %v1791_v48, %v1168_v56  ;;  %v1171_v30 = vadd.f32 1.0, %v1155_v58 }
 0x1f0   : > { %1236 = vst.msk [vmem:[%s1995_s7 + $0x28] sm:$0xff] %vm1230_vm15, %v1219_v8  ;;  %v1154_v12 = vmin.f32 %v1987_v21, %v1091_v27  ;;  %v1624_v32 = vpop.f32.mrf.mxu1  ;;  %v1145_v56 = vmul.f32 %v1980_v7, %v1958_v46 }
 0x1f1   : > { %1235 = vst.msk [vmem:[%s1995_s7 + $0x20] sm:$0xff] %vm1230_vm15, %v1218_v28  ;;  %v1221_v36 = vadd.f32 %v1205_v59, %v1791_v48  ;;  %v1204_v61 = vmul.f32 %v1188_v29, %v1136_v26  ;;  %v1191_v33 = vadd.f32 %v1791_v48, %v1171_v30  ;;  %v1157_v34 = vmin.f32 %v1598_v35, %v1624_v32 }
 0x1f2   : > { %v1170_v50 = vadd.f32 1.0, %v1154_v12  ;;  %v1101_v51 = vpop.f32.mrf.mxu1 }
 0x1f3   : > { %1238 = vst.msk [vmem:[%s1995_s7 + $0x38] sm:$0xff] %vm1230_vm15, %v1221_v36  ;;  %v1220_v37 = vadd.f32 %v1204_v61, %v1791_v48  ;;  %v1207_v62 = vmul.f32 %v1191_v33, %v1139_v31  ;;  %v1173_v21 = vadd.f32 1.0, %v1157_v34  ;;  %v1156_v52 = vmin.f32 %v956_v63, %v1101_v51 }
 0x1f4   : > { %v1190_v38 = vadd.f32 %v1791_v48, %v1170_v50  ;;  %v1627_v35 = vpop.f32.mrf.mxu1 }
 0x1f5   : > { %1237 = vst.msk [vmem:[%s1995_s7 + $0x30] sm:$0xff] %vm1230_vm15, %v1220_v37  ;;  %v1223_v53 = vadd.f32 %v1207_v62, %v1791_v48  ;;  %v1193_v60 = vadd.f32 %v1791_v48, %v1173_v21  ;;  %v1172_v10 = vadd.f32 1.0, %v1156_v52  ;;  %v1159_v11 = vmin.f32 %v1601_v25, %v1627_v35 }
 0x1f6   : > { %v1206_v55 = vmul.f32 %v1190_v38, %v1138_v54  ;;  %v1111_v39 = vpop.f32.mrf.mxu1  ;;  %v1144_v25 = vmul.f32 %v1982_v9, %v1962_v49 }
 0x1f7   : > { %1240 = vst.msk [vmem:[%s1995_s7 + $0x48] sm:$0xff] %vm1230_vm15, %v1223_v53  ;;  %v1209_v40 = vmul.f32 %v1193_v60, %v1141_v57  ;;  %v1192_v0 = vadd.f32 %v1791_v48, %v1172_v10  ;;  %v1175_v1 = vadd.f32 1.0, %v1159_v11  ;;  %v1158_v63 = vmin.f32 %v966_v23, %v1111_v39 }
 0x1f8   : > { %v1222_v15 = vadd.f32 %v1206_v55, %v1791_v48  ;;  %v1630_v16 = vpop.f32.mrf.mxu1 }
 0x1f9   : > { %v1225_v42 = vadd.f32 %v1209_v40, %v1791_v48  ;;  %v1208_v3 = vmul.f32 %v1192_v0, %v1140_v41  ;;  %v1195_v17 = vadd.f32 %v1791_v48, %v1175_v1  ;;  %v1174_v2 = vadd.f32 1.0, %v1158_v63 }
 0x1fa   : > { %1239 = vst.msk [vmem:[%s1995_s7 + $0x40] sm:$0xff] %vm1230_vm15, %v1222_v15  ;;  %v1161_v20 = vmin.f32 %v1604_v13, %v1630_v16  ;;  %v1121_v22 = vpop.f32.mrf.mxu1 }
 0x1fb   : > { %1242 = vst.msk [vmem:[%s1995_s7 + $0x58] sm:$0xff] %vm1230_vm15, %v1225_v42  ;;  %v1224_v43 = vadd.f32 %v1208_v3, %v1791_v48  ;;  %v1211_v4 = vmul.f32 %v1195_v17, %v1143_v14  ;;  %v1194_v5 = vadd.f32 %v1791_v48, %v1174_v2  ;;  %v1160_v24 = vmin.f32 %v976_v18, %v1121_v22 }
 0x1fc   : > { %v1177_v44 = vadd.f32 1.0, %v1161_v20 }
 0x1fd   : > { %1241 = vst.msk [vmem:[%s1995_s7 + $0x50] sm:$0xff] %vm1230_vm15, %v1224_v43  ;;  %v1227_v45 = vadd.f32 %v1211_v4, %v1791_v48  ;;  %v1210_v6 = vmul.f32 %v1194_v5, %v1142_v19  ;;  %v1176_v47 = vadd.f32 1.0, %v1160_v24 }
 0x1fe   : > { %v1197_v58 = vadd.f32 %v1791_v48, %v1177_v44 }
 0x1ff   : > { %1244 = vst.msk [vmem:[%s1995_s7 + $0x68] sm:$0xff] %vm1230_vm15, %v1227_v45  ;;  %v1226_v26 = vadd.f32 %v1210_v6, %v1791_v48  ;;  %v1196_v8 = vadd.f32 %v1791_v48, %v1176_v47 }
 0x200   : > { %v1213_v27 = vmul.f32 %v1197_v58, %v1145_v56 }
 0x201   : > { %1243 = vst.msk [vmem:[%s1995_s7 + $0x60] sm:$0xff] %vm1230_vm15, %v1226_v26  ;;  %v1212_v28 = vmul.f32 %v1196_v8, %v1144_v25 }
 0x202   : > { %v1229_v59 = vadd.f32 %v1213_v27, %v1791_v48 }
 0x203   : > { %v1228_v29 = vadd.f32 %v1212_v28, %v1791_v48 }
 0x204   : > { %1246 = vst.msk [vmem:[%s1995_s7 + $0x78] sm:$0xff] %vm1230_vm15, %v1229_v59 }
 0x205   : > { %1245 = vst.msk [vmem:[%s1995_s7 + $0x70] sm:$0xff] %vm1230_vm15, %v1228_v29 }
 0x206 PF: > { %s12_s9 = sadd.s32 1, %s1656_s9  }
 0x207   : > { %p9_p4 = scmp.ge.s32.totalorder %s12_s9, 4  }
 0x209   :  { %11 = sbr.rel (!%p9_p4) target bundleno = 1 (0x1), region = 58 }

</bundles_post_ra>
